<compile_context>
chip_gen: v7x
topology: tpu7x:2x2x1
jax: 0.10.0
libtpu: 0.0.40
codegen_flags: <defaults>
</compile_context>

<pallas_src>
import functools
import math

import jax
import jax.numpy as jnp
from jax import lax
from jax.experimental import pallas as pl
from jax.experimental.pallas import tpu as pltpu

EPS = 1e-5          # torch.nn.LayerNorm default
NEG_INF = -1e30     # large-negative mask bias (avoids inf-inf NaNs)


def _layernorm(z, gamma=None, beta=None):
    mu = jnp.mean(z, axis=-1, keepdims=True)
    var = jnp.mean((z - mu) ** 2, axis=-1, keepdims=True)
    y = (z - mu) * lax.rsqrt(var + EPS)
    if gamma is not None:
        y = y * gamma + beta
    return y


# --------------------------------------------------------------------------
# Kernel A: tcond FiLM (norm0, no affine) -> norm1 (affine) -> QKV projection
#           q/k/v emitted head-major (B, H, N, hd); q pre-scaled by 1/sqrt(hd).
# --------------------------------------------------------------------------
def pre_attn_kernel(x_ref, tcond_ref, wt_ref, bt_ref, g1_ref, be1_ref, wqkv_ref,
                    x1_ref, q_ref, k_ref, v_ref, *, n_heads):
    D = x_ref.shape[-1]
    hd = D // n_heads
    scale = 1.0 / math.sqrt(hd)

    x = x_ref[0].astype(jnp.float32)                     # (TM, D)
    tc = tcond_ref[0]                                    # (TM, tcond_dim)

    # tcond FiLM: x1 = norm0(x) * (1 + alpha) + beta
    ab = jnp.dot(tc.astype(jnp.bfloat16), wt_ref[...],
                 preferred_element_type=jnp.float32) + bt_ref[...]
    x1 = _layernorm(x) * (1.0 + ab[:, :D]) + ab[:, D:]

    # norm1 (elementwise affine) then QKV projection (no bias)
    hn = _layernorm(x1, g1_ref[...], be1_ref[...])
    qkv = jnp.dot(hn.astype(jnp.bfloat16), wqkv_ref[...],
                  preferred_element_type=jnp.float32)    # (TM, 3D)

    x1_ref[0] = x1.astype(x1_ref.dtype)                  # bf16 intermediate
    qs = qkv[:, :D] * scale                              # fold 1/sqrt(hd) here
    for h in range(n_heads):
        sl = slice(h * hd, (h + 1) * hd)
        q_ref[0, h] = qs[:, sl].astype(q_ref.dtype)
        k_ref[0, h] = qkv[:, D + h * hd:D + (h + 1) * hd].astype(k_ref.dtype)
        v_ref[0, h] = qkv[:, 2 * D + h * hd:2 * D + (h + 1) * hd].astype(v_ref.dtype)


# --------------------------------------------------------------------------
# Kernel B: flash block-causal attention + residual + cond FiLM + MLP + residual
# --------------------------------------------------------------------------
def attn_post_kernel(q_ref, k_ref, v_ref, x1_ref, condab_ref,
                     g3_ref, be3_ref, w1_ref, b1_ref, w2_ref, b2_ref,
                     o_ref, m_sc, l_sc, acc_sc,
                     *, n_heads, chunk, tq, tk):
    qi = pl.program_id(1)
    ki = pl.program_id(2)
    hd = q_ref.shape[-1]
    D = n_heads * hd

    @pl.when(ki == 0)
    def _init():
        m_sc[...] = jnp.full_like(m_sc, NEG_INF)
        l_sc[...] = jnp.zeros_like(l_sc)
        acc_sc[...] = jnp.zeros_like(acc_sc)

    q_first_chunk = (qi * tq) // chunk
    q_last_chunk = (qi * tq + tq - 1) // chunk
    k_first_chunk = (ki * tk) // chunk
    k_last_chunk = (ki * tk + tk - 1) // chunk

    def attend(bias):
        qh = q_ref[0]                                    # (H, tq, hd) bf16
        kh = k_ref[0]                                    # (H, tk, hd) bf16
        vh = v_ref[0]                                    # (H, tk, hd) bf16
        s = jnp.einsum('hqd,hkd->hqk', qh, kh,
                       preferred_element_type=jnp.float32)   # q pre-scaled
        if bias is not None:
            s = s + bias
        m_prev = m_sc[...]                               # (H, tq, 1)
        m_new = jnp.maximum(m_prev, jnp.max(s, axis=-1, keepdims=True))
        alpha = jnp.exp(m_prev - m_new)
        p = jnp.exp(s - m_new)
        l_sc[...] = alpha * l_sc[...] + jnp.sum(p, axis=-1, keepdims=True)
        acc_sc[...] = alpha * acc_sc[...] + jnp.einsum(
            'hqk,hkd->hqd', p.astype(jnp.bfloat16), vh,
            preferred_element_type=jnp.float32)
        m_sc[...] = m_new

    # fully visible: every key chunk in this block <= every query chunk
    fully_visible = k_last_chunk <= q_first_chunk
    # partially visible (diagonal): needs the in-kernel chunk-causal mask
    partially_visible = jnp.logical_and(k_first_chunk <= q_last_chunk,
                                        jnp.logical_not(fully_visible))
    # NOTE: ki must ascend from 0 (it does) so fully-masked rows inside a
    # partial block are correctly washed out by the online-softmax rescale.

    @pl.when(fully_visible)
    def _full():
        attend(None)

    @pl.when(partially_visible)
    def _partial():
        row = qi * tq + lax.broadcasted_iota(jnp.int32, (tq, tk), 0)
        col = ki * tk + lax.broadcasted_iota(jnp.int32, (tq, tk), 1)
        bias = jnp.where((col // chunk) <= (row // chunk), 0.0, NEG_INF)
        attend(bias[None])                               # broadcast over heads

    @pl.when(ki == pl.num_programs(2) - 1)
    def _finalize():
        # exact reciprocal: runs once per q tile, negligible cost
        attn = acc_sc[...] / l_sc[...]                   # (H, tq, hd) f32
        attn2 = jnp.concatenate([attn[h] for h in range(n_heads)], axis=-1)
        x2 = attn2 + x1_ref[0].astype(jnp.float32)       # residual 1

        # cond FiLM: x3 = norm2(x2) * (1 + alpha) + beta (projection hoisted)
        ab2 = condab_ref[0]                              # (1, 2D) f32
        x3 = _layernorm(x2) * (1.0 + ab2[:, :D]) + ab2[:, D:]

        # MLP on norm3(x3) + residual
        # TODO(synk): mlp_class is gin-injected in the original; assuming the
        # standard Linear -> GELU(tanh approx) -> Linear with dropout_level=0.
        hm = _layernorm(x3, g3_ref[...], be3_ref[...])
        h1 = jnp.dot(hm.astype(jnp.bfloat16), w1_ref[...],
                     preferred_element_type=jnp.float32) + b1_ref[...]
        h1 = jax.nn.gelu(h1, approximate=True)
        h2 = jnp.dot(h1.astype(jnp.bfloat16), w2_ref[...],
                     preferred_element_type=jnp.float32) + b2_ref[...]
        o_ref[0] = (h2 + x3).astype(o_ref.dtype)


# --------------------------------------------------------------------------
# Wrapper
# --------------------------------------------------------------------------
def decoder_block(x, cond, tcond, params, n_heads, attention_chunk_size):
    B, N, D = x.shape
    T = tcond.shape[-1]
    Dh = params["w1"].shape[1]
    hd = D // n_heads
    chunk = attention_chunk_size

    # bf16 weights for the MXU (accumulation stays f32 in-kernel)
    wt = params["wt"].astype(jnp.bfloat16)
    wqkv = params["wqkv"].astype(jnp.bfloat16)
    w1 = params["w1"].astype(jnp.bfloat16)
    w2 = params["w2"].astype(jnp.bfloat16)

    # cond FiLM projection hoisted out of the attention kernel: a degenerate
    # M=1 matmul per batch element, done once in plain XLA.
    cond_ab = (cond @ params["wc"] + params["bc"]).reshape(B, 1, 2 * D)
    cond_ab = cond_ab.astype(jnp.float32)

    # VMEM budget per device generation (v5e/v6e ~96 MiB, v7x ~48 MiB).
    try:
        vmem_cap = getattr(pltpu.get_tpu_info(), "vmem_capacity_bytes",
                           64 * 1024 * 1024)
    except Exception:  # pragma: no cover - conservative fallback
        vmem_cap = 64 * 1024 * 1024
    vmem_limit = int(min(vmem_cap * 3 // 4, 96 * 1024 * 1024))

    # Sequence tile sizes: full N for small shapes, 512 when VMEM allows
    # (v5e/v6e), else 256.
    if N <= 256:
        TM = N
    elif vmem_limit >= 64 * 1024 * 1024 and N % 512 == 0:
        TM = 512
    else:
        TM = 256
    assert N % TM == 0, "sequence length must divide the row tile"
    TQ = TK = TM
    n_kv_blocks = N // TK

    cparams2 = pltpu.CompilerParams(
        dimension_semantics=("parallel", "parallel"),
        vmem_limit_bytes=vmem_limit)
    cparams3 = pltpu.CompilerParams(
        dimension_semantics=("parallel", "parallel", "arbitrary"),
        vmem_limit_bytes=vmem_limit)

    # ---- Kernel A: FiLM(tcond) + norm1 + QKV projection (head-major out) ----
    kernel_a = functools.partial(pre_attn_kernel, n_heads=n_heads)
    x1, q, k, v = pl.pallas_call(
        kernel_a,
        out_shape=(jax.ShapeDtypeStruct((B, N, D), jnp.bfloat16),
                   jax.ShapeDtypeStruct((B, n_heads, N, hd), jnp.bfloat16),
                   jax.ShapeDtypeStruct((B, n_heads, N, hd), jnp.bfloat16),
                   jax.ShapeDtypeStruct((B, n_heads, N, hd), jnp.bfloat16)),
        grid_spec=pltpu.PrefetchScalarGridSpec(
            num_scalar_prefetch=0,
            grid=(B, N // TM),
            in_specs=[
                pl.BlockSpec((1, TM, D), lambda b, m: (b, m, 0)),    # x
                pl.BlockSpec((1, TM, T), lambda b, m: (b, m, 0)),    # tcond
                pl.BlockSpec((T, 2 * D), lambda b, m: (0, 0)),       # wt
                pl.BlockSpec((1, 2 * D), lambda b, m: (0, 0)),       # bt
                pl.BlockSpec((1, D), lambda b, m: (0, 0)),           # g1
                pl.BlockSpec((1, D), lambda b, m: (0, 0)),           # be1
                pl.BlockSpec((D, 3 * D), lambda b, m: (0, 0)),       # wqkv
            ],
            out_specs=[
                pl.BlockSpec((1, TM, D), lambda b, m: (b, m, 0)),            # x1
                pl.BlockSpec((1, n_heads, TM, hd), lambda b, m: (b, 0, m, 0)),  # q
                pl.BlockSpec((1, n_heads, TM, hd), lambda b, m: (b, 0, m, 0)),  # k
                pl.BlockSpec((1, n_heads, TM, hd), lambda b, m: (b, 0, m, 0)),  # v
            ],
        ),
        compiler_params=cparams2,
    )(x, tcond, wt, params["bt"], params["g1"], params["be1"], wqkv)

    # kv index map clamped to the last visible kv block for this q tile:
    # fully-masked future blocks repeat the previous block index -> no new DMA.
    def kv_index_map(b, i, kk):
        q_last_chunk = (i * TQ + TQ - 1) // chunk
        last_vis = jnp.minimum(((q_last_chunk + 1) * chunk - 1) // TK,
                               n_kv_blocks - 1)
        return (b, 0, jnp.minimum(kk, last_vis), 0)

    # ---- Kernel B: flash block-causal attention + cond FiLM + MLP ----
    kernel_b = functools.partial(attn_post_kernel, n_heads=n_heads,
                                 chunk=chunk, tq=TQ, tk=TK)
    out = pl.pallas_call(
        kernel_b,
        out_shape=jax.ShapeDtypeStruct((B, N, D), x.dtype),
        grid_spec=pltpu.PrefetchScalarGridSpec(
            num_scalar_prefetch=0,
            grid=(B, N // TQ, N // TK),
            in_specs=[
                pl.BlockSpec((1, n_heads, TQ, hd),
                             lambda b, i, kk: (b, 0, i, 0)),          # q
                pl.BlockSpec((1, n_heads, TK, hd), kv_index_map),     # k
                pl.BlockSpec((1, n_heads, TK, hd), kv_index_map),     # v
                pl.BlockSpec((1, TQ, D), lambda b, i, kk: (b, i, 0)),  # x1 (bf16)
                pl.BlockSpec((1, 1, 2 * D), lambda b, i, kk: (b, 0, 0)),  # cond ab
                pl.BlockSpec((1, D), lambda b, i, kk: (0, 0)),        # g3
                pl.BlockSpec((1, D), lambda b, i, kk: (0, 0)),        # be3
                pl.BlockSpec((D, Dh), lambda b, i, kk: (0, 0)),       # w1
                pl.BlockSpec((1, Dh), lambda b, i, kk: (0, 0)),       # b1
                pl.BlockSpec((Dh, D), lambda b, i, kk: (0, 0)),       # w2
                pl.BlockSpec((1, D), lambda b, i, kk: (0, 0)),        # b2
            ],
            out_specs=pl.BlockSpec((1, TQ, D), lambda b, i, kk: (b, i, 0)),
            scratch_shapes=[
                pltpu.VMEM((n_heads, TQ, 1), jnp.float32),   # running max m
                pltpu.VMEM((n_heads, TQ, 1), jnp.float32),   # running sum l
                pltpu.VMEM((n_heads, TQ, hd), jnp.float32),  # output accumulator
            ],
        ),
        compiler_params=cparams3,
    )(q, k, v, x1, cond_ab, params["g3"], params["be3"],
      w1, params["b1"], w2, params["b2"])
    return out


if __name__ == "__main__":
    # embed_dim=128 -> n_heads = embed_dim // 64 = 2, head_dim 64.
    B, N, D = 2, 8, 128
    cond_dim, tcond_dim = 32, 32
    mlp_multiplier = 2
    attention_chunk_size = 4
    n_heads = D // 64

    key = jax.random.PRNGKey(0)
    keys = jax.random.split(key, 12)

    x = jax.random.normal(keys[0], (B, N, D), jnp.float32)
    cond = jax.random.normal(keys[1], (B, cond_dim), jnp.float32)
    tcond = jax.random.normal(keys[2], (B, N, tcond_dim), jnp.float32)

    def lin(k, fan_in, shape):
        bound = 1.0 / math.sqrt(fan_in)
        return jax.random.uniform(k, shape, jnp.float32, -bound, bound)

    params = dict(
        # tcond_linear: (tcond_dim -> 2*D), with bias
        wt=lin(keys[3], tcond_dim, (tcond_dim, 2 * D)),
        bt=lin(keys[4], tcond_dim, (1, 2 * D)),
        # norm1 (elementwise affine, default init)
        g1=jnp.ones((1, D), jnp.float32),
        be1=jnp.zeros((1, D), jnp.float32),
        # qkv_linear: (D -> 3*D), no bias
        wqkv=lin(keys[5], D, (D, 3 * D)),
        # cond linear: (cond_dim -> 2*D), with bias
        wc=lin(keys[6], cond_dim, (cond_dim, 2 * D)),
        bc=lin(keys[7], cond_dim, (1, 2 * D)),
        # norm3 (elementwise affine, default init)
        g3=jnp.ones((1, D), jnp.float32),
        be3=jnp.zeros((1, D), jnp.float32),
        # MLP
        w1=lin(keys[8], D, (D, mlp_multiplier * D)),
        b1=lin(keys[9], D, (1, mlp_multiplier * D)),
        w2=lin(keys[10], mlp_multiplier * D, (mlp_multiplier * D, D)),
        b2=lin(keys[11], mlp_multiplier * D, (1, D)),
    )

    out = decoder_block(x, cond, tcond, params, n_heads, attention_chunk_size)
    out = jax.block_until_ready(out)
    assert out.shape == (B, N, D)
    assert bool(jnp.all(jnp.isfinite(out)))
    print("KERNEL_OK")
</pallas_src>

<mosaic_0001>
module attributes {stable_mosaic.version = 11 : i64} {
  func.func @pre_attn_kernel(%arg0: i32, %arg1: i32, %arg2: memref<1x8x128xf32, #tpu.memory_space<vmem>>, %arg3: memref<1x8x32xf32, #tpu.memory_space<vmem>>, %arg4: memref<32x256xbf16, #tpu.memory_space<vmem>>, %arg5: memref<1x256xf32, #tpu.memory_space<vmem>>, %arg6: memref<1x128xf32, #tpu.memory_space<vmem>>, %arg7: memref<1x128xf32, #tpu.memory_space<vmem>>, %arg8: memref<128x384xbf16, #tpu.memory_space<vmem>>, %arg9: memref<1x8x128xbf16, #tpu.memory_space<vmem>>, %arg10: memref<1x2x8x64xbf16, #tpu.memory_space<vmem>>, %arg11: memref<1x2x8x64xbf16, #tpu.memory_space<vmem>>, %arg12: memref<1x2x8x64xbf16, #tpu.memory_space<vmem>>) attributes {dimension_semantics = [#tpu.dimension_semantics<parallel>, #tpu.dimension_semantics<parallel>], iteration_bounds = array<i64: 2, 1>, scalar_prefetch = 0 : i64, scratch_operands = 0 : i64, tpu.core_type = #tpu.core_type<tc>, window_params = [{transform_indices = @transform_0, window_bounds = array<i64: 1, 8, 128>}, {transform_indices = @transform_1, window_bounds = array<i64: 1, 8, 32>}, {pipeline_mode = #tpu.pipeline_mode<synchronous>, transform_indices = @transform_2, window_bounds = array<i64: 32, 256>}, {pipeline_mode = #tpu.pipeline_mode<synchronous>, transform_indices = @transform_3, window_bounds = array<i64: 1, 256>}, {pipeline_mode = #tpu.pipeline_mode<synchronous>, transform_indices = @transform_4, window_bounds = array<i64: 1, 128>}, {pipeline_mode = #tpu.pipeline_mode<synchronous>, transform_indices = @transform_5, window_bounds = array<i64: 1, 128>}, {pipeline_mode = #tpu.pipeline_mode<synchronous>, transform_indices = @transform_6, window_bounds = array<i64: 128, 384>}, {transform_indices = @transform_7, window_bounds = array<i64: 1, 8, 128>}, {transform_indices = @transform_8, window_bounds = array<i64: 1, 2, 8, 64>}, {transform_indices = @transform_9, window_bounds = array<i64: 1, 2, 8, 64>}, {transform_indices = @transform_10, window_bounds = array<i64: 1, 2, 8, 64>}]} {
    %c0 = arith.constant 0 : index
    %c0_0 = arith.constant 0 : index
    %c0_1 = arith.constant 0 : index
    %0 = vector.load %arg2[%c0, %c0_0, %c0_1] : memref<1x8x128xf32, #tpu.memory_space<vmem>>, vector<1x8x128xf32>
    %1 = vector.shape_cast %0 : vector<1x8x128xf32> to vector<8x128xf32>
    %c0_2 = arith.constant 0 : index
    %c0_3 = arith.constant 0 : index
    %c0_4 = arith.constant 0 : index
    %2 = vector.load %arg3[%c0_2, %c0_3, %c0_4] : memref<1x8x32xf32, #tpu.memory_space<vmem>>, vector<1x8x32xf32>
    %3 = vector.shape_cast %2 : vector<1x8x32xf32> to vector<8x32xf32>
    %4 = arith.truncf %3 : vector<8x32xf32> to vector<8x32xbf16>
    %c0_5 = arith.constant 0 : index
    %c0_6 = arith.constant 0 : index
    %5 = vector.load %arg4[%c0_5, %c0_6] : memref<32x256xbf16, #tpu.memory_space<vmem>>, vector<32x256xbf16>
    %cst = arith.constant dense<0.000000e+00> : vector<8x256xf32>
    %6 = tpu.matmul %4, %5, %cst {dimension_numbers = #tpu.dot_dimension_numbers<[1], [0], [0], [1], [0, 0, 1, 1], [], []>} : vector<8x32xbf16>, vector<32x256xbf16>, vector<8x256xf32> -> vector<8x256xf32>
    %c0_7 = arith.constant 0 : index
    %c0_8 = arith.constant 0 : index
    %7 = vector.load %arg5[%c0_7, %c0_8] : memref<1x256xf32, #tpu.memory_space<vmem>>, vector<1x256xf32>
    %8 = vector.broadcast %7 : vector<1x256xf32> to vector<8x256xf32>
    %9 = arith.addf %6, %8 : vector<8x256xf32>
    %cst_9 = arith.constant dense<0.000000e+00> : vector<8xf32>
    %10 = vector.multi_reduction <add>, %1, %cst_9 [1] : vector<8x128xf32> to vector<8xf32>
    %11 = vector.shape_cast %10 : vector<8xf32> to vector<8x1xf32>
    %cst_10 = arith.constant 1.280000e+02 : f32
    %12 = vector.broadcast %cst_10 : f32 to vector<8x1xf32>
    %13 = arith.divf %11, %12 : vector<8x1xf32>
    %14 = vector.broadcast %13 : vector<8x1xf32> to vector<8x128xf32>
    %15 = arith.subf %1, %14 : vector<8x128xf32>
    %16 = arith.mulf %15, %15 : vector<8x128xf32>
    %cst_11 = arith.constant dense<0.000000e+00> : vector<8xf32>
    %17 = vector.multi_reduction <add>, %16, %cst_11 [1] : vector<8x128xf32> to vector<8xf32>
    %18 = vector.shape_cast %17 : vector<8xf32> to vector<8x1xf32>
    %cst_12 = arith.constant 1.280000e+02 : f32
    %19 = vector.broadcast %cst_12 : f32 to vector<8x1xf32>
    %20 = arith.divf %18, %19 : vector<8x1xf32>
    %21 = vector.broadcast %13 : vector<8x1xf32> to vector<8x128xf32>
    %22 = arith.subf %1, %21 : vector<8x128xf32>
    %cst_13 = arith.constant 9.99999974E-6 : f32
    %23 = vector.broadcast %cst_13 : f32 to vector<8x1xf32>
    %24 = arith.addf %20, %23 : vector<8x1xf32>
    %25 = math.rsqrt %24 : vector<8x1xf32>
    %26 = vector.broadcast %25 : vector<8x1xf32> to vector<8x128xf32>
    %27 = arith.mulf %22, %26 : vector<8x128xf32>
    %28 = vector.extract_strided_slice %9 {offsets = [0, 0], sizes = [8, 128], strides = [1, 1]} : vector<8x256xf32> to vector<8x128xf32>
    %cst_14 = arith.constant 1.000000e+00 : f32
    %29 = vector.broadcast %cst_14 : f32 to vector<8x128xf32>
    %30 = arith.addf %29, %28 : vector<8x128xf32>
    %31 = arith.mulf %27, %30 : vector<8x128xf32>
    %32 = vector.extract_strided_slice %9 {offsets = [0, 128], sizes = [8, 128], strides = [1, 1]} : vector<8x256xf32> to vector<8x128xf32>
    %33 = arith.addf %31, %32 : vector<8x128xf32>
    %c0_15 = arith.constant 0 : index
    %c0_16 = arith.constant 0 : index
    %34 = vector.load %arg6[%c0_15, %c0_16] : memref<1x128xf32, #tpu.memory_space<vmem>>, vector<1x128xf32>
    %c0_17 = arith.constant 0 : index
    %c0_18 = arith.constant 0 : index
    %35 = vector.load %arg7[%c0_17, %c0_18] : memref<1x128xf32, #tpu.memory_space<vmem>>, vector<1x128xf32>
    %cst_19 = arith.constant dense<0.000000e+00> : vector<8xf32>
    %36 = vector.multi_reduction <add>, %33, %cst_19 [1] : vector<8x128xf32> to vector<8xf32>
    %37 = vector.shape_cast %36 : vector<8xf32> to vector<8x1xf32>
    %cst_20 = arith.constant 1.280000e+02 : f32
    %38 = vector.broadcast %cst_20 : f32 to vector<8x1xf32>
    %39 = arith.divf %37, %38 : vector<8x1xf32>
    %40 = vector.broadcast %39 : vector<8x1xf32> to vector<8x128xf32>
    %41 = arith.subf %33, %40 : vector<8x128xf32>
    %42 = arith.mulf %41, %41 : vector<8x128xf32>
    %cst_21 = arith.constant dense<0.000000e+00> : vector<8xf32>
    %43 = vector.multi_reduction <add>, %42, %cst_21 [1] : vector<8x128xf32> to vector<8xf32>
    %44 = vector.shape_cast %43 : vector<8xf32> to vector<8x1xf32>
    %cst_22 = arith.constant 1.280000e+02 : f32
    %45 = vector.broadcast %cst_22 : f32 to vector<8x1xf32>
    %46 = arith.divf %44, %45 : vector<8x1xf32>
    %47 = vector.broadcast %39 : vector<8x1xf32> to vector<8x128xf32>
    %48 = arith.subf %33, %47 : vector<8x128xf32>
    %cst_23 = arith.constant 9.99999974E-6 : f32
    %49 = vector.broadcast %cst_23 : f32 to vector<8x1xf32>
    %50 = arith.addf %46, %49 : vector<8x1xf32>
    %51 = math.rsqrt %50 : vector<8x1xf32>
    %52 = vector.broadcast %51 : vector<8x1xf32> to vector<8x128xf32>
    %53 = arith.mulf %48, %52 : vector<8x128xf32>
    %54 = vector.broadcast %34 : vector<1x128xf32> to vector<8x128xf32>
    %55 = arith.mulf %53, %54 : vector<8x128xf32>
    %56 = vector.broadcast %35 : vector<1x128xf32> to vector<8x128xf32>
    %57 = arith.addf %55, %56 : vector<8x128xf32>
    %58 = arith.truncf %57 : vector<8x128xf32> to vector<8x128xbf16>
    %c0_24 = arith.constant 0 : index
    %c0_25 = arith.constant 0 : index
    %59 = vector.load %arg8[%c0_24, %c0_25] : memref<128x384xbf16, #tpu.memory_space<vmem>>, vector<128x384xbf16>
    %cst_26 = arith.constant dense<0.000000e+00> : vector<8x384xf32>
    %60 = tpu.matmul %58, %59, %cst_26 {dimension_numbers = #tpu.dot_dimension_numbers<[1], [0], [0], [1], [0, 0, 1, 1], [], []>} : vector<8x128xbf16>, vector<128x384xbf16>, vector<8x384xf32> -> vector<8x384xf32>
    %61 = arith.truncf %33 : vector<8x128xf32> to vector<8x128xbf16>
    %c0_27 = arith.constant 0 : index
    %c0_28 = arith.constant 0 : index
    %c0_29 = arith.constant 0 : index
    %62 = vector.load %arg9[%c0_27, %c0_28, %c0_29] : memref<1x8x128xbf16, #tpu.memory_space<vmem>>, vector<1x8x128xbf16>
    %63 = vector.shape_cast %62 : vector<1x8x128xbf16> to vector<8x128xbf16>
    %64 = vector.shape_cast %61 : vector<8x128xbf16> to vector<1x8x128xbf16>
    tpu.vector_store %arg9[%c0_27, %c0_28, %c0_29], %64 {strides = array<i32>} : memref<1x8x128xbf16, #tpu.memory_space<vmem>>, vector<1x8x128xbf16>,
    %65 = vector.extract_strided_slice %60 {offsets = [0, 0], sizes = [8, 128], strides = [1, 1]} : vector<8x384xf32> to vector<8x128xf32>
    %cst_30 = arith.constant 1.250000e-01 : f32
    %66 = vector.broadcast %cst_30 : f32 to vector<8x128xf32>
    %67 = arith.mulf %65, %66 : vector<8x128xf32>
    %68 = vector.extract_strided_slice %67 {offsets = [0, 0], sizes = [8, 64], strides = [1, 1]} : vector<8x128xf32> to vector<8x64xf32>
    %69 = arith.truncf %68 : vector<8x64xf32> to vector<8x64xbf16>
    %c0_31 = arith.constant 0 : index
    %c0_32 = arith.constant 0 : index
    %c0_33 = arith.constant 0 : index
    %c0_34 = arith.constant 0 : index
    %70 = vector.load %arg10[%c0_31, %c0_32, %c0_33, %c0_34] : memref<1x2x8x64xbf16, #tpu.memory_space<vmem>>, vector<1x1x8x64xbf16>
    %71 = vector.shape_cast %70 : vector<1x1x8x64xbf16> to vector<8x64xbf16>
    %72 = vector.shape_cast %69 : vector<8x64xbf16> to vector<1x1x8x64xbf16>
    tpu.vector_store %arg10[%c0_31, %c0_32, %c0_33, %c0_34], %72 {strides = array<i32>} : memref<1x2x8x64xbf16, #tpu.memory_space<vmem>>, vector<1x1x8x64xbf16>,
    %73 = vector.extract_strided_slice %60 {offsets = [0, 128], sizes = [8, 64], strides = [1, 1]} : vector<8x384xf32> to vector<8x64xf32>
    %74 = arith.truncf %73 : vector<8x64xf32> to vector<8x64xbf16>
    %c0_35 = arith.constant 0 : index
    %c0_36 = arith.constant 0 : index
    %c0_37 = arith.constant 0 : index
    %c0_38 = arith.constant 0 : index
    %75 = vector.load %arg11[%c0_35, %c0_36, %c0_37, %c0_38] : memref<1x2x8x64xbf16, #tpu.memory_space<vmem>>, vector<1x1x8x64xbf16>
    %76 = vector.shape_cast %75 : vector<1x1x8x64xbf16> to vector<8x64xbf16>
    %77 = vector.shape_cast %74 : vector<8x64xbf16> to vector<1x1x8x64xbf16>
    tpu.vector_store %arg11[%c0_35, %c0_36, %c0_37, %c0_38], %77 {strides = array<i32>} : memref<1x2x8x64xbf16, #tpu.memory_space<vmem>>, vector<1x1x8x64xbf16>,
    %78 = vector.extract_strided_slice %60 {offsets = [0, 256], sizes = [8, 64], strides = [1, 1]} : vector<8x384xf32> to vector<8x64xf32>
    %79 = arith.truncf %78 : vector<8x64xf32> to vector<8x64xbf16>
    %c0_39 = arith.constant 0 : index
    %c0_40 = arith.constant 0 : index
    %c0_41 = arith.constant 0 : index
    %c0_42 = arith.constant 0 : index
    %80 = vector.load %arg12[%c0_39, %c0_40, %c0_41, %c0_42] : memref<1x2x8x64xbf16, #tpu.memory_space<vmem>>, vector<1x1x8x64xbf16>
    %81 = vector.shape_cast %80 : vector<1x1x8x64xbf16> to vector<8x64xbf16>
    %82 = vector.shape_cast %79 : vector<8x64xbf16> to vector<1x1x8x64xbf16>
    tpu.vector_store %arg12[%c0_39, %c0_40, %c0_41, %c0_42], %82 {strides = array<i32>} : memref<1x2x8x64xbf16, #tpu.memory_space<vmem>>, vector<1x1x8x64xbf16>,
    %83 = vector.extract_strided_slice %67 {offsets = [0, 64], sizes = [8, 64], strides = [1, 1]} : vector<8x128xf32> to vector<8x64xf32>
    %84 = arith.truncf %83 : vector<8x64xf32> to vector<8x64xbf16>
    %c0_43 = arith.constant 0 : index
    %c1 = arith.constant 1 : index
    %c0_44 = arith.constant 0 : index
    %c0_45 = arith.constant 0 : index
    %85 = vector.load %arg10[%c0_43, %c1, %c0_44, %c0_45] : memref<1x2x8x64xbf16, #tpu.memory_space<vmem>>, vector<1x1x8x64xbf16>
    %86 = vector.shape_cast %85 : vector<1x1x8x64xbf16> to vector<8x64xbf16>
    %87 = vector.shape_cast %84 : vector<8x64xbf16> to vector<1x1x8x64xbf16>
    tpu.vector_store %arg10[%c0_43, %c1, %c0_44, %c0_45], %87 {strides = array<i32>} : memref<1x2x8x64xbf16, #tpu.memory_space<vmem>>, vector<1x1x8x64xbf16>,
    %88 = vector.extract_strided_slice %60 {offsets = [0, 192], sizes = [8, 64], strides = [1, 1]} : vector<8x384xf32> to vector<8x64xf32>
    %89 = arith.truncf %88 : vector<8x64xf32> to vector<8x64xbf16>
    %c0_46 = arith.constant 0 : index
    %c1_47 = arith.constant 1 : index
    %c0_48 = arith.constant 0 : index
    %c0_49 = arith.constant 0 : index
    %90 = vector.load %arg11[%c0_46, %c1_47, %c0_48, %c0_49] : memref<1x2x8x64xbf16, #tpu.memory_space<vmem>>, vector<1x1x8x64xbf16>
    %91 = vector.shape_cast %90 : vector<1x1x8x64xbf16> to vector<8x64xbf16>
    %92 = vector.shape_cast %89 : vector<8x64xbf16> to vector<1x1x8x64xbf16>
    tpu.vector_store %arg11[%c0_46, %c1_47, %c0_48, %c0_49], %92 {strides = array<i32>} : memref<1x2x8x64xbf16, #tpu.memory_space<vmem>>, vector<1x1x8x64xbf16>,
    %93 = vector.extract_strided_slice %60 {offsets = [0, 320], sizes = [8, 64], strides = [1, 1]} : vector<8x384xf32> to vector<8x64xf32>
    %94 = arith.truncf %93 : vector<8x64xf32> to vector<8x64xbf16>
    %c0_50 = arith.constant 0 : index
    %c1_51 = arith.constant 1 : index
    %c0_52 = arith.constant 0 : index
    %c0_53 = arith.constant 0 : index
    %95 = vector.load %arg12[%c0_50, %c1_51, %c0_52, %c0_53] : memref<1x2x8x64xbf16, #tpu.memory_space<vmem>>, vector<1x1x8x64xbf16>
    %96 = vector.shape_cast %95 : vector<1x1x8x64xbf16> to vector<8x64xbf16>
    %97 = vector.shape_cast %94 : vector<8x64xbf16> to vector<1x1x8x64xbf16>
    tpu.vector_store %arg12[%c0_50, %c1_51, %c0_52, %c0_53], %97 {strides = array<i32>} : memref<1x2x8x64xbf16, #tpu.memory_space<vmem>>, vector<1x1x8x64xbf16>,
    return
  }
  func.func @transform_0(%arg0: i32, %arg1: i32) -> (i32, i32, i32) {
    %c0_i32 = arith.constant 0 : i32
    %c0_i32_0 = arith.constant 0 : i32
    return %arg0, %arg1, %c0_i32 : i32, i32, i32
  }
  func.func @transform_1(%arg0: i32, %arg1: i32) -> (i32, i32, i32) {
    %c0_i32 = arith.constant 0 : i32
    %c0_i32_0 = arith.constant 0 : i32
    return %arg0, %arg1, %c0_i32 : i32, i32, i32
  }
  func.func @transform_2(%arg0: i32, %arg1: i32) -> (i32, i32) {
    %c0_i32 = arith.constant 0 : i32
    %c0_i32_0 = arith.constant 0 : i32
    %c0_i32_1 = arith.constant 0 : i32
    return %c0_i32, %c0_i32_0 : i32, i32
  }
  func.func @transform_3(%arg0: i32, %arg1: i32) -> (i32, i32) {
    %c0_i32 = arith.constant 0 : i32
    %c0_i32_0 = arith.constant 0 : i32
    %c0_i32_1 = arith.constant 0 : i32
    return %c0_i32, %c0_i32_0 : i32, i32
  }
  func.func @transform_4(%arg0: i32, %arg1: i32) -> (i32, i32) {
    %c0_i32 = arith.constant 0 : i32
    %c0_i32_0 = arith.constant 0 : i32
    %c0_i32_1 = arith.constant 0 : i32
    return %c0_i32, %c0_i32_0 : i32, i32
  }
  func.func @transform_5(%arg0: i32, %arg1: i32) -> (i32, i32) {
    %c0_i32 = arith.constant 0 : i32
    %c0_i32_0 = arith.constant 0 : i32
    %c0_i32_1 = arith.constant 0 : i32
    return %c0_i32, %c0_i32_0 : i32, i32
  }
  func.func @transform_6(%arg0: i32, %arg1: i32) -> (i32, i32) {
    %c0_i32 = arith.constant 0 : i32
    %c0_i32_0 = arith.constant 0 : i32
    %c0_i32_1 = arith.constant 0 : i32
    return %c0_i32, %c0_i32_0 : i32, i32
  }
  func.func @transform_7(%arg0: i32, %arg1: i32) -> (i32, i32, i32) {
    %c0_i32 = arith.constant 0 : i32
    %c0_i32_0 = arith.constant 0 : i32
    return %arg0, %arg1, %c0_i32 : i32, i32, i32
  }
  func.func @transform_8(%arg0: i32, %arg1: i32) -> (i32, i32, i32, i32) {
    %c0_i32 = arith.constant 0 : i32
    %c0_i32_0 = arith.constant 0 : i32
    %c0_i32_1 = arith.constant 0 : i32
    return %arg0, %c0_i32, %arg1, %c0_i32_0 : i32, i32, i32, i32
  }
  func.func @transform_9(%arg0: i32, %arg1: i32) -> (i32, i32, i32, i32) {
    %c0_i32 = arith.constant 0 : i32
    %c0_i32_0 = arith.constant 0 : i32
    %c0_i32_1 = arith.constant 0 : i32
    return %arg0, %c0_i32, %arg1, %c0_i32_0 : i32, i32, i32, i32
  }
  func.func @transform_10(%arg0: i32, %arg1: i32) -> (i32, i32, i32, i32) {
    %c0_i32 = arith.constant 0 : i32
    %c0_i32_0 = arith.constant 0 : i32
    %c0_i32_1 = arith.constant 0 : i32
    return %arg0, %c0_i32, %arg1, %c0_i32_0 : i32, i32, i32, i32
  }
}

</mosaic_0001>

<bundles_post_ra>
// kernel: tpu_custom_call.1
= control target key start
LH: loop header
LB: loop body
LE: loop exit
PB: predicated region body
PF: predicated region fallthrough
CT: control target
= control target key end

     0   :  { %s2257_s0 = inlined_call_operand.hbm [shape: f32[2,8,128], index: 0, kind: input, shape index: {}]   ;;  %s2258_s1 = inlined_call_operand.hbm [shape: f32[2,8,32], index: 1, kind: input, shape index: {}]   ;;  %s2259_s2 = inlined_call_operand.hbm [shape: bf16[32,256], index: 2, kind: input, shape index: {}]   ;;  %s2260_s3 = inlined_call_operand.vmem [shape: f32[1,256], index: 3, kind: input, shape index: {}]   ;;  %s2261_s4 = inlined_call_operand.vmem [shape: f32[1,128], index: 4, kind: input, shape index: {}]   ;;  %s2262_s5 = inlined_call_operand.vmem [shape: f32[1,128], index: 5, kind: input, shape index: {}]   ;;  %s2263_s6 = inlined_call_operand.hbm [shape: bf16[128,384], index: 6, kind: input, shape index: {}]   ;;  %s2264_s7 = inlined_call_operand.hbm [shape: bf16[2,8,128], index: 7, kind: output, shape index: {0}]   ;;  %s2265_s8 = inlined_call_operand.hbm [shape: bf16[2,2,8,64], index: 8, kind: output, shape index: {1}]   ;;  %s2266_s9 = inlined_call_operand.hbm [shape: bf16[2,2,8,64], index: 9, kind: output, shape index: {2}]   ;;  %s2267_s10 = inlined_call_operand.hbm [shape: bf16[2,2,8,64], index: 10, kind: output, shape index: {3}]  }
   0x1   :  { %2282 = sst [smem:[#allocation28_spill]] %s2257_s0 }
   0x2   :  { %2283 = sst [smem:[#allocation29_spill]] %s2258_s1 }
   0x3   :  { %2284 = sst [smem:[#allocation30_spill]] %s2259_s2 }
   0x4   :  { %2285 = sst [smem:[#allocation31_spill]] %s2260_s3 }
   0x5   :  { %2286 = sst [smem:[#allocation32_spill]] %s2263_s6 }
   0x6   :  { %2287 = sst [smem:[#allocation33_spill]] %s2266_s9 }
   0x7   :  { %2288 = sst [smem:[#allocation34_spill]] %s2267_s10 }
   0x8   :  { %16 = vsyncpa [#allocation3], 0 }
   0x9   :  { %18 = vsyncpa [#allocation3 + $0x1], 0 }
   0xa   :  { %19 = vsyncpa [#allocation6], 0 }
   0xb   :  { %21 = vsyncpa [#allocation6 + $0x1], 0 }
   0xc   :  { %22 = vsyncpa [#allocation9], 0 }
   0xd   :  { %23 = vsyncpa [#allocation4], 0 }
   0xe   :  { %25 = vsyncpa [#allocation4 + $0x1], 0 }
   0xf   :  { %26 = vsyncpa [#allocation12], 0 }
  0x10   :  { %28 = vsyncpa [#allocation12 + $0x1], 0 }
  0x11   :  { %29 = vsyncpa [#allocation15], 0 }
  0x12   :  { %31 = vsyncpa [#allocation15 + $0x1], 0  ;;  %s1835_s13 = smov 0   ;;  %s1837_s14 = smov 0  }
  0x13   :  { %s1839_s15 = smov 0   ;;  %s1841_s16 = smov 0  }
  0x14   :  { %s1843_s17 = smov 0   ;;  %s1845_s18 = smov 0  }
  0x15 LB: > { %2289 = sst [smem:[#allocation23_spill]] %s1741_s13  ;;  %s1866_s19 = sadd.s32 4294967295, %s1761_s18   ;;  %s1761_s18 = sphi %s1845_s18, %s37_s18   ;;  %s1757_s17 = sphi %s1843_s17, %s2325_s17   ;;  %s1753_s16 = sphi %s1841_s16, %s2324_s16   ;;  %s1749_s15 = sphi %s1839_s15, %s2328_s15   ;;  %s1745_s14 = sphi %s1837_s14, %s2327_s14   ;;  %s1741_s13 = sphi %s1835_s13, %s2326_s13  }
  0x16   : > { %2290 = sst [smem:[#allocation24_spill]] %s1757_s17  ;;  %s2268_s20 = sadd.s32 4294967294, %s1761_s18  }
  0x17   : > { %p71_p0 = scmp.ne.s32.totalorder %s1745_s14, %s1741_s13  ;;  %p2270_p1 = scmp.eq.s32.totalorder %s1866_s19, 0 }
  0x18   : > { %p236_p3 = scmp.eq.s32.totalorder %s2268_s20, 1  ;;  %p1203_p5 = scmp.ge.s32.totalorder %s1761_s18, 1 }
  0x19   : > { %p1877_p4 = por %p2270_p1, %p71_p0  ;;  %p327_p7 = scmp.lt.s32.totalorder %s1761_s18, 3 }
  0x1a   : > { %p1882_p6 = por %p236_p3, %p71_p0  ;;  %s1763_s24 = smov [#allocation7]  }
  0x1b   : > { %s2291_s21 = scalar_select %p1877_p4, 1, 0 }
  0x1c   : > { %s2292_s22 = scalar_select %p1882_p6, 1, 0 }
  0x1d   : > { %p1887_p8 = pnand %p1203_p5, %p327_p7  ;;  %s339_s25 = sshll.u32 %s1763_s24, 4  ;;  %s1891_s25 = int_to_ptr.vmem [resolvable:$true] %s339_s25 }
  0x1e   : > { %2293 = sst [smem:[#allocation25_spill]] %s2292_s22  ;;  %s1764_s27 = smov [#allocation8]  }
  0x1f   : > { %s2294_s23 = scalar_select %p1887_p8, 1, 0 }
  0x20   : > { %p1325_p9 = pneg %p1887_p8  ;;  %s361_s28 = sshll.u32 %s1764_s27, 4  ;;  %s1902_s28 = int_to_ptr.vmem [resolvable:$true] %s361_s28 }
  0x21   : > { %s2296_s2 = sld [smem:[#allocation30_spill]] }
  0x22   : > { %p1898_p11 = pnand %p1325_p9, %p2270_p1 }
  0x24   : > { %p1461_p13 = pneg %p1898_p11 }
  0x27   : > { %s1459_s11 = scalar_lea.hbm %s2296_s2, 512 }
  0x28   : > { %p1460_p12 = scmp.ne.s32.totalorder %s2296_s2, %s1459_s11  ;;  %p1466_p5 = scmp.lt.u32.totalorder %s1459_s11, %s2296_s2 }
  0x2a   : > { %p1462_p0 = pnand %p1461_p13, %p1460_p12 }
  0x2c   : > { %p1463_p3 = pneg %p1462_p0 }
  0x2e   : > { %p1468_p7 = pnand %p1466_p5, %p1463_p3 }
  0x30   : > { %1471 = shalt.err (!%p1468_p7)
}
  0x31   : > { %s1472_s27 = scalar_lea.vmem %s1891_s25, 512  ;;  %p1480_p2 = scmp.lt.s32.totalorder %s1891_s25, %s1891_s25 }
  0x32   : > { %p1473_p9 = scmp.ne.s32.totalorder %s1891_s25, %s1472_s27  ;;  %p1481_p12 = scmp.lt.s32.totalorder %s1472_s27, %s1472_s27 }
  0x34   : > { %p1475_p10 = pnand %p1473_p9, %p1461_p13  ;;  %p1482_p0 = por %p1481_p12, %p1480_p2 }
  0x36   : > { %p1476_p1 = pneg %p1475_p10 }
  0x38   : > { %p1483_p6 = pnand %p1482_p0, %p1476_p1 }
  0x3a   : > { %1486 = shalt.err (!%p1483_p6)
}
  0x3b   : > { %s1765_s20 = smov 128   ;;  %s1766_s22 = smov 8  }
  0x3c   : > { %1328 = dma.hbm_to_vmem [thread:$0]  (!%p1898_p11), %s2296_s2, 512, %s1891_s25, [#allocation6], %s1765_s20, %s1765_s20, %s1766_s22  }
  0x3d   : > { %s2297_s6 = sld [smem:[#allocation32_spill]] }
  0x43   : > { %s1487_s24 = scalar_lea.hbm %s2297_s6, 3072 }
  0x44   : > { %p1488_p2 = scmp.ne.s32.totalorder %s2297_s6, %s1487_s24  ;;  %p1494_p10 = scmp.lt.u32.totalorder %s1487_s24, %s2297_s6 }
  0x46   : > { %p1490_p1 = pnand %p1488_p2, %p1461_p13 }
  0x48   : > { %p1491_p6 = pneg %p1490_p1 }
  0x4a   : > { %p1496_p3 = pnand %p1494_p10, %p1491_p6 }
  0x4c   : > { %1499 = shalt.err (!%p1496_p3)
}
  0x4d   : > { %s1500_s25 = scalar_lea.vmem %s1902_s28, 3072  ;;  %p1508_p12 = scmp.lt.s32.totalorder %s1902_s28, %s1902_s28 }
  0x4e   : > { %p1501_p5 = scmp.ne.s32.totalorder %s1902_s28, %s1500_s25  ;;  %p1509_p0 = scmp.lt.s32.totalorder %s1500_s25, %s1500_s25 }
  0x50   : > { %p1503_p7 = pnand %p1501_p5, %p1461_p13  ;;  %p1510_p2 = por %p1509_p0, %p1508_p12 }
  0x52   : > { %p1504_p9 = pneg %p1503_p7 }
  0x54   : > { %p1511_p1 = pnand %p1510_p2, %p1504_p9 }
  0x56   : > { %1514 = shalt.err (!%p1511_p1)
}
  0x57   : > { %s1767_s9 = smov 192   ;;  %s1768_s10 = smov 12  }
  0x58   : > { %1331 = dma.hbm_to_vmem [thread:$0]  (!%p1898_p11), %s2297_s6, 3072, %s1902_s28, [#allocation9], %s1767_s9, %s1767_s9, %s1768_s10  }
  0x59   : > { %s49_s22 = sadd.s32 1, %s1757_s17  ;;  %s58_s29 = sadd.s32 1, %s1749_s15 }
  0x5a   : > { %p51_p13 = scmp.ge.s32.totalorder %s49_s22, 2  ;;  %p65_p6 = scmp.ne.s32.totalorder %s1749_s15, %s1745_s14 }
  0x5b   : > { %p66_p10 = scmp.eq.s32.totalorder %s1761_s18, 0  ;;  %p1354_p3 = scmp.lt.s32.totalorder %s1761_s18, 2 }
  0x5c   : > { %s2330_s22 = smov (%p51_p13, %s49_s22), 0  ;;  %p2299_p7 = scmp.eq.s32.totalorder %s1866_s19, 1 }
  0x5d   : > { %2298 = sst [smem:[#allocation26_spill]] %s2330_s22  ;;  %p67_p5 = por %p66_p10, %p65_p6 }
  0x5e   : > { %p1966_p9 = por %p2299_p7, %p65_p6  ;;  %s53_s26 = ssub.s32 %s1757_s17, %s2330_s22 }
  0x5f   : > { %s375_s11 = sand.u32 1, %s1749_s15   ;;  %p56_p12 = scmp.eq.s32.totalorder %s53_s26, 0 }
  0x60   : > { %s2300_s30 = scalar_select %p1966_p9, 1, 0 }
  0x61   : > { %s1973_s28 = sshll.u32 %s375_s11, 3  ;;  %s1208_s12 = sshll.u32 %s1757_s17, 7 }
  0x62   : > { %s1977_s24 = scalar_select %p56_p12, %s1749_s15, %s58_s29  }
  0x63   : > { %s2302_s0 = sld [smem:[#allocation28_spill]]  ;;  %s379_s10 = scalar_lea.vmem [#allocation2], %s1973_s28 }
  0x64   : > { %2301 = sst [smem:[#allocation27_spill]] %s1977_s24  ;;  %s387_s13 = sshll.u32 %s379_s10, 4  ;;  %s1991_s13 = int_to_ptr.vmem [resolvable:$true] %s387_s13 }
  0x65   : > { %p1987_p11 = pnand %p1354_p3, %p67_p5  ;;  %s2304_s1 = sld [smem:[#allocation29_spill]] }
  0x66   : > { %s376_s25 = scalar_lea.sflag [#allocation3], %s375_s11 }
  0x67   : > { %p1517_p2 = pneg %p1987_p11 }
  0x69   : > { %s1982_s9 = scalar_lea.hbm %s2302_s0, %s1208_s12  ;;  %s1520_s22 = scalar_lea.hbm %s2302_s0, 256 }
  0x6a   : > { %s1515_s2 = scalar_lea.hbm %s1982_s9, 128  ;;  %p1521_p6 = scmp.lt.u32.totalorder %s1982_s9, %s2302_s0 }
  0x6b   : > { %s1996_s27 = scalar_lea.hbm %s2304_s1, %s1208_s12  ;;  %p1516_p0 = scmp.ne.s32.totalorder %s1982_s9, %s1515_s2 }
  0x6c   : > { %p1522_p10 = scmp.lt.u32.totalorder %s1520_s22, %s1515_s2  ;;  %p1524_p5 = scmp.lt.u32.totalorder %s1515_s2, %s1982_s9 }
  0x6d   : > { %p1518_p1 = pnand %p1517_p2, %p1516_p0 }
  0x6e   : > { %p1523_p3 = por %p1522_p10, %p1521_p6 }
  0x6f   : > { %p1519_p13 = pneg %p1518_p1 }
  0x70   : > { %p1525_p7 = por %p1524_p5, %p1523_p3 }
  0x72   : > { %p1526_p12 = pnand %p1525_p7, %p1519_p13 }
  0x74   : > { %1529 = shalt.err (!%p1526_p12)
}
  0x75   : > { %s1530_s11 = scalar_lea.vmem %s1991_s13, 128  ;;  %s1769_s6 = smov [#allocation2]  }
  0x76   : > { %p1531_p0 = scmp.ne.s32.totalorder %s1991_s13, %s1530_s11  ;;  %s1535_s12 = sshll.u32 %s1769_s6, 4  ;;  %s1536_s12 = int_to_ptr.vmem [resolvable:$false] %s1535_s12 }
  0x77   : > { %s1537_s17 = scalar_lea.vmem %s1536_s12, 256  ;;  %p1538_p4 = scmp.lt.s32.totalorder %s1991_s13, %s1536_s12 }
  0x78   : > { %p1533_p1 = pnand %p1531_p0, %p1517_p2  ;;  %p1539_p6 = scmp.lt.s32.totalorder %s1537_s17, %s1530_s11 }
  0x7a   : > { %p1534_p9 = pneg %p1533_p1  ;;  %p1540_p10 = por %p1539_p6, %p1538_p4 }
  0x7c   : > { %p1541_p3 = pnand %p1540_p10, %p1534_p9 }
  0x7e   : > { %1544 = shalt.err (!%p1541_p3)
}
  0x7f   : > { %1335 = dma.hbm_to_vmem [thread:$0]  (!%p1987_p11), %s1982_s9, 128, %s1991_s13, %s376_s25  }
  0x80   : > { %s394_s2 = sand.u32 1, %s1761_s18   ;;  %s398_s22 = scalar_lea.vmem [#allocation5], %s1973_s28 }
  0x81   : > { %s406_s24 = sshll.u32 %s398_s22, 4  ;;  %s395_s29 = scalar_lea.sflag [#allocation6], %s394_s2  ;;  %s407_s24 = int_to_ptr.vmem [resolvable:$true] %s406_s24 }
  0x82   : > { %s1545_s26 = scalar_lea.hbm %s1996_s27, 128  ;;  %s1550_s6 = scalar_lea.hbm %s2304_s1, 256 }
  0x83   : > { %p1546_p4 = scmp.ne.s32.totalorder %s1996_s27, %s1545_s26  ;;  %p1551_p5 = scmp.lt.u32.totalorder %s1996_s27, %s2304_s1 }
  0x84   : > { %p1552_p7 = scmp.lt.u32.totalorder %s1550_s6, %s1545_s26  ;;  %p1554_p0 = scmp.lt.u32.totalorder %s1545_s26, %s1996_s27 }
  0x85   : > { %p1548_p9 = pnand %p1546_p4, %p1517_p2 }
  0x86   : > { %p1553_p12 = por %p1552_p7, %p1551_p5 }
  0x87   : > { %p1549_p13 = pneg %p1548_p9 }
  0x88   : > { %p1555_p1 = por %p1554_p0, %p1553_p12 }
  0x8a   : > { %p1556_p6 = pnand %p1555_p1, %p1549_p13 }
  0x8c   : > { %1559 = shalt.err (!%p1556_p6)
}
  0x8d   : > { %s1560_s28 = scalar_lea.vmem %s407_s24, 128  ;;  %s1770_s9 = smov [#allocation5]  }
  0x8e   : > { %p1561_p10 = scmp.ne.s32.totalorder %s407_s24, %s1560_s28  ;;  %s1565_s13 = sshll.u32 %s1770_s9, 4  ;;  %s1566_s13 = int_to_ptr.vmem [resolvable:$false] %s1565_s13 }
  0x8f   : > { %s1567_s25 = scalar_lea.vmem %s1566_s13, 256  ;;  %p1568_p9 = scmp.lt.s32.totalorder %s407_s24, %s1566_s13 }
  0x90   : > { %p1563_p3 = pnand %p1561_p10, %p1517_p2  ;;  %p1569_p8 = scmp.lt.s32.totalorder %s1567_s25, %s1560_s28 }
  0x92   : > { %p1564_p4 = pneg %p1563_p3  ;;  %p1570_p5 = por %p1569_p8, %p1568_p9 }
  0x94   : > { %p1571_p7 = pnand %p1570_p5, %p1564_p4 }
  0x96   : > { %1574 = shalt.err (!%p1571_p7)
}
  0x97   : > { %1338 = dma.hbm_to_vmem [thread:$0]  (!%p1987_p11), %s1996_s27, 128, %s407_s24, %s395_s29  }
  0x98   : > { %p2305_p13 = scmp.ne.s32.totalorder %s2294_s23, 0 }
  0x99   : > { %s2047_s2 = sand.u32 (!%p2305_p13), 1, %s1745_s14   ;;  %p2306_p8 = scmp.ne.s32.totalorder (!%p2305_p13), %s2291_s21, 0 }
  0x9a   : > { %415 = sbr.rel (%p2305_p13) target bundleno = 1196 (0x4ac), region = 48  ;;  %s2050_s22 = sshll.u32 (!%p2305_p13), %s2047_s2, 3 }
  0x9b   : > { %s418_s26 = scalar_lea.sflag (!%p2305_p13), [#allocation3], %s2047_s2  ;;  %s421_s10 = scalar_lea.vmem (!%p2305_p13), [#allocation2], %s2050_s22 }
  0xa1   : > { %1712 = dma.done.wait (%p2306_p8), %s418_s26, 128  }
  0xa2   : > { %1714 = vsyncadd (%p2306_p8), %s418_s26, 4294967168  ;;  %s2281_s23 = sand.u32 1, %s1866_s19   ;;  %s430_s27 = scalar_lea.vmem [#allocation5], %s2050_s22 }
  0xa3   : > { %s427_s20 = scalar_lea.sflag [#allocation6], %s2281_s23 }
  0xa4   : > { %1716 = dma.done.wait (%p2306_p8), %s427_s20, 128  }
  0xa5   : > { %1718 = vsyncadd (%p2306_p8), %s427_s20, 4294967168  ;;  %p2307_p11 = scmp.eq.s32.totalorder %s1866_s19, 0 }
  0xa7   : > { %1720 = dma.done.wait (%p2307_p11), [#allocation6], 512   ;;  %p2308_p2 = pmov %p2307_p11 }
  0xa9   : > { %1722 = vsyncadd (%p2308_p2), [#allocation6], 4294966784  ;;  %p2309_p12 = pmov %p2308_p2 }
  0xaa   : > { %p2310_p0 = pmov %p2308_p2 }
  0xab   : > { %1724 = dma.done.wait (%p2309_p12), [#allocation9], 3072  }
  0xac   : > { %1726 = vsyncadd (%p2310_p0), [#allocation9], 4294964224  ;;  %v1771_v0 = vmov 0   ;;  %v496_v1 = vld [vmem:[%s421_s10] sm:$0xff]  ;;  %v1420_v4 = vld [vmem:[#allocation7 + $0x14] ss:$8 sps:$4 sm:$0xff]   ;;  %v505_v16 = vlaneseq }
  0xad   : > { %571 = vmatprep.mubr.bf16.mxu0 %v1771_v0  ;;  %815 = vmatprep.mubr.bf16.mxu1 %v1771_v0  ;;  %v1417_v2 = vld [vmem:[#allocation7 + $0x4] ss:$8 sps:$4 sm:$0xff]   ;;  %v1419_v3 = vld [vmem:[#allocation7] ss:$8 sps:$4 sm:$0xff]   ;;  %v1422_v5 = vld [vmem:[#allocation7 + $0x10] ss:$8 sps:$4 sm:$0xff]  }
  0xae   : > { %580 = vadd.xlane.f32.xlu0 %v496_v1  ;;  %539 = vmatprep.subr.bf16.mxu0 %v1417_v2  ;;  %v497_v6 = vld [vmem:[%s430_s27] sm:$0xff]  ;;  %vm535_vm0 = vcmask 261120   ;;  %v506_v17 = vshrl.u32 %v505_v16, 7  ;;  %s2311_s3 = sld [smem:[#allocation31_spill]]  ;;  %s1216_s29 = sshll.u32 %s2047_s2, 2  ;;  %v1772_v36 = vmov 0.0  }
  0xaf   : > { %540 = vmatpush1.bf16.msra.mxu0 %v1419_v3  ;;  %v498_v7 = vpack.c.bf16 %v497_v6, %v497_v6  ;;  %s2078_s11 = scalar_lea.vmem [#allocation10], %s1216_s29  ;;  %v1423_v34 = vld [vmem:[#allocation8 + $0x4] ss:$12 sps:$4 sm:$0xff]   ;;  %v1425_v35 = vld [vmem:[#allocation8] ss:$12 sps:$4 sm:$0xff]   ;;  %vm1773_vm1 = vmmov 0  }
  0xb0   : > { %541 = vmatprep.subr.bf16.mxu0 %v1420_v4  ;;  %v507_v20 = vsub.s32 0, %v506_v17  ;;  %v511_v25 = vsub.s32 1, %v506_v17  ;;  %v1426_v37 = vld [vmem:[#allocation8 + $0x8] ss:$12 sps:$4 sm:$0xff]   ;;  %783 = vmatprep.subr.bf16.mxu1 %v1423_v34  ;;  %v1429_v39 = vld [vmem:[#allocation8 + $0x18] ss:$12 sps:$4 sm:$0xff]  }
  0xb1   : > { %v1427_v38 = vld [vmem:[#allocation8 + $0x1c] ss:$12 sps:$4 sm:$0xff]   ;;  %784 = vmatpush1.bf16.msra.mxu1 %v1425_v35  ;;  %v1430_v40 = vld [vmem:[#allocation8 + $0x20] ss:$12 sps:$4 sm:$0xff]   ;;  %v1434_v47 = vld [vmem:[#allocation8 + $0x38] ss:$12 sps:$4 sm:$0xff]  }
  0xb2   : > { %785 = vmatprep.subr.bf16.mxu1 %v1427_v38  ;;  %v1431_v41 = vld [vmem:[#allocation8 + $0x34] ss:$12 sps:$4 sm:$0xff]   ;;  %v1433_v46 = vld [vmem:[#allocation8 + $0x30] ss:$12 sps:$4 sm:$0xff]   ;;  %v1435_v48 = vld [vmem:[#allocation8 + $0x4c] ss:$12 sps:$4 sm:$0xff]  }
  0xb3   : > { %542 = vmatpush1.bf16.msra.mxu0 %v1422_v5  ;;  %v1437_v49 = vld [vmem:[#allocation8 + $0x48] ss:$12 sps:$4 sm:$0xff]   ;;  %v1438_v50 = vld [vmem:[#allocation8 + $0x50] ss:$12 sps:$4 sm:$0xff]   ;;  %v1441_v52 = vld [vmem:[#allocation8 + $0x60] ss:$12 sps:$4 sm:$0xff]  }
  0xb4   : > { %v503_v22 = vld [vmem:[%s2311_s3] sm:$0x3]  ;;  %1285 = vmatprep.subr.bf16.mxu0 %v1772_v36  ;;  %v1439_v51 = vld [vmem:[#allocation8 + $0x64] ss:$12 sps:$4 sm:$0xff]   ;;  %v1442_v53 = vld [vmem:[#allocation8 + $0x68] ss:$12 sps:$4 sm:$0xff]  }
  0xb5   : > { %v508_v23 = vrot.slane %v503_v22, %v507_v20  ;;  %v512_v27 = vrot.slane %v503_v22, %v511_v25  ;;  %786 = vmatpush1.bf16.msra.mxu1 %v1429_v39  ;;  %v1443_v54 = vld [vmem:[#allocation8 + $0x7c] ss:$12 sps:$4 sm:$0xff]   ;;  %v1445_v55 = vld [vmem:[#allocation8 + $0x78] ss:$12 sps:$4 sm:$0xff]   ;;  %v1446_v56 = vld [vmem:[#allocation8 + $0x80] ss:$12 sps:$4 sm:$0xff]  }
  0xb6   : > { %1224 = vmatmul.mubr.msk.bf16.vlgmr.msra.gmra.mrb[0].mxu0 %vm535_vm0, %v498_v7  ;;  %787 = vmatprep.subr.bf16.mxu1 %v1431_v41  ;;  %v1447_v57 = vld [vmem:[#allocation8 + $0x94] ss:$12 sps:$4 sm:$0xff]   ;;  %v1449_v58 = vld [vmem:[#allocation8 + $0x90] ss:$12 sps:$4 sm:$0xff]   ;;  %v1450_v59 = vld [vmem:[#allocation8 + $0x98] ss:$12 sps:$4 sm:$0xff]  }
  0xb7   : > { %1286 = vmatpush3.bf16.msra.mxu0 %v1426_v37  ;;  %1301 = vmatprep.mubr.msk.bf16.mxu0 %vm1773_vm1, %v1772_v36  ;;  %v1451_v60 = vld [vmem:[#allocation8 + $0xac] ss:$12 sps:$4 sm:$0xff]   ;;  %v1453_v61 = vld [vmem:[#allocation8 + $0xa8] ss:$12 sps:$4 sm:$0xff]   ;;  %v1454_v62 = vld [vmem:[#allocation8 + $0xb0] ss:$12 sps:$4 sm:$0xff]  }
  0xb8   : > { %1287 = vmatprep.subr.bf16.mxu0 %v1772_v36  ;;  %v1225_v3 = vld [vmem:[%s2261_s4] ss:$0 sm:$0xff]  ;;  %s1261_s9 = sshll.u32 %s1753_s16, 6  ;;  %s928_s13 = sshll.u32 %s2078_s11, 4  ;;  %s929_s13 = int_to_ptr.vmem [resolvable:$true] %s928_s13 }
  0xb9   : > { %788 = vmatpush1.bf16.msra.mxu1 %v1433_v46  ;;  %v1226_v5 = vld [vmem:[%s2262_s5] ss:$0 sm:$0xff]  ;;  %s2092_s10 = scalar_lea.hbm %s2264_s7, %s1261_s9  ;;  %s899_s20 = scalar_lea.sflag [#allocation4], %s2047_s2 }
  0xba   : > { %789 = vmatprep.subr.bf16.mxu1 %v1435_v48  ;;  %s1575_s27 = scalar_lea.vmem %s929_s13, 64  ;;  %p2312_p6 = scmp.ne.s32.totalorder %s2300_s30, 0 }
  0xbb   : > { %1288 = vmatpush3.bf16.msra.mxu0 %v1430_v40  ;;  %p1576_p1 = scmp.ne.s32.totalorder %s929_s13, %s1575_s27  ;;  %s1774_s21 = smov [#allocation10]  }
  0xbc   : > { %1289 = vmatprep.subr.bf16.mxu0 %v1772_v36  ;;  %s1579_s24 = sshll.u32 %s1774_s21, 4  ;;  %s1580_s24 = int_to_ptr.vmem [resolvable:$false] %s1579_s24 }
  0xbd   : > { %790 = vmatpush1.bf16.msra.mxu1 %v1437_v49  ;;  %p1577_p10 = pnand %p1576_p1, %p2312_p6  ;;  %s1581_s29 = scalar_lea.vmem %s1580_s24, 128 }
  0xbe   : > { %791 = vmatprep.subr.bf16.mxu1 %v1439_v51  ;;  %p1582_p4 = scmp.lt.s32.totalorder %s929_s13, %s1580_s24  ;;  %p1583_p9 = scmp.lt.s32.totalorder %s1581_s29, %s1575_s27 }
  0xbf   : > { %1290 = vmatpush3.bf16.msra.mxu0 %v1434_v47  ;;  %p1578_p3 = pneg %p1577_p10 }
  0xc0   : > { %1291 = vmatprep.subr.bf16.mxu0 %v1772_v36  ;;  %p1584_p5 = por %p1583_p9, %p1582_p4 }
  0xc1   : > { %792 = vmatpush1.bf16.msra.mxu1 %v1441_v52 }
  0xc2   : > { %793 = vmatprep.subr.bf16.mxu1 %v1443_v54  ;;  %p1585_p7 = pnand %p1584_p5, %p1578_p3 }
  0xc3   : > { %1292 = vmatpush3.bf16.msra.mxu0 %v1438_v50 }
  0xc4   : > { %1293 = vmatprep.subr.bf16.mxu0 %v1772_v36 }
  0xc5   : > { %794 = vmatpush1.bf16.msra.mxu1 %v1445_v55 }
  0xc6   : > { %795 = vmatprep.subr.bf16.mxu1 %v1447_v57 }
  0xc7   : > { %1294 = vmatpush3.bf16.msra.mxu0 %v1442_v53 }
  0xc8   : > { %1295 = vmatprep.subr.bf16.mxu0 %v1772_v36 }
  0xc9   : > { %796 = vmatpush1.bf16.msra.mxu1 %v1449_v58 }
  0xca   : > { %797 = vmatprep.subr.bf16.mxu1 %v1451_v60 }
  0xcb   : > { %1296 = vmatpush3.bf16.msra.mxu0 %v1446_v56 }
  0xcc   : > { %1297 = vmatprep.subr.bf16.mxu0 %v1772_v36 }
  0xcd   : > { %798 = vmatpush1.bf16.msra.mxu1 %v1453_v61 }
  0xcf   : > { %1298 = vmatpush3.bf16.msra.mxu0 %v1450_v59 }
  0xd0   : > { %1299 = vmatprep.subr.bf16.mxu0 %v1772_v36 }
  0xd3   : > { %1300 = vmatpush3.bf16.msra.mxu0 %v1454_v62 }
 0x13b   : > { %v581_v8 = vpop.xlane.xlu0 %580 }
 0x13c   : > { %v583_v9 = vmul.f32 0.0078125, %v581_v8 }
 0x13e   : > { %v584_v10 = vsub.f32 %v496_v1, %v583_v9 }
 0x140   : > { %v585_v11 = vmul.f32 %v584_v10, %v584_v10 }
 0x142   : > { %586 = vadd.xlane.f32.xlu0 %v585_v11 }
 0x189   : > { %v573_v12 = vpop.f32.mrb[0].mxu0 }
 0x18a   : > { %v575_v13 = vpop.f32.mrb[1].mxu0  ;;  %v574_v24 = vadd.f32 %v573_v12, %v508_v23 }
 0x18b   : > { %v577_v14 = vpop.f32.mrb[2].mxu0  ;;  %v576_v31 = vadd.f32 %v575_v13, %v512_v27 }
 0x18c   : > { %v578_v15 = vpop.f32.mrb[3].mxu0  ;;  %v592_v26 = vadd.f32 1.0, %v574_v24 }
 0x1cf   : > { %v587_v18 = vpop.xlane.xlu0 %586 }
 0x1d0   : > { %v588_v19 = vmul.f32 0.0078125, %v587_v18 }
 0x1d2   : > { %v589_v21 = vadd.f32 1e-05, %v588_v19 }
 0x1d4   : > { %1455 = vrsqrt.f32 %v589_v21 }
 0x1de   : > { %v1456_v28 = vpop.eup %1455 }
 0x1df   : > { %v591_v29 = vmul.f32 %v1456_v28, %v584_v10 }
 0x1e1   : > { %v593_v30 = vmul.f32 %v592_v26, %v591_v29 }
 0x1e3   : > { %v594_v32 = vadd.f32 %v593_v30, %v576_v31 }
 0x1e5   : > { %v864_v33 = vpack.c.bf16 %v594_v32, %v594_v32  ;;  %597 = vadd.xlane.f32.xlu1 %v594_v32 }
 0x1e7   : > { %865 = vst [vmem:[%s2078_s11] sm:$0xf] %v864_v33 }
 0x272   : > { %v598_v42 = vpop.xlane.xlu1 %597 }
 0x273   : > { %v599_v43 = vmul.f32 0.0078125, %v598_v42 }
 0x275   : > { %v600_v44 = vsub.f32 %v594_v32, %v599_v43 }
 0x277   : > { %v601_v45 = vmul.f32 %v600_v44, %v600_v44 }
 0x279   : > { %602 = vadd.xlane.f32.xlu1 %v601_v45 }
 0x306   : > { %v603_v63 = vpop.xlane.xlu1 %602 }
 0x307   : > { %v604_v0 = vmul.f32 0.0078125, %v603_v63 }
 0x309   : > { %v605_v1 = vadd.f32 1e-05, %v604_v0 }
 0x30b   : > { %1457 = vrsqrt.f32 %v605_v1 }
 0x315   : > { %v1458_v2 = vpop.eup %1457 }
 0x316   : > { %v607_v4 = vmul.f32 %v1458_v2, %v600_v44 }
 0x318   : > { %v614_v6 = vmul.f32 %v1225_v3, %v607_v4 }
 0x31a   : > { %v621_v7 = vadd.f32 %v1226_v5, %v614_v6 }
 0x31c   : > { %v622_v8 = vpack.c.bf16 %v621_v7, %v621_v7 }
 0x31e   : > { %816 = vmatmul.mubr.bf16.vlgmr.msra.gmra.mrb[0].mxu1 %v622_v8  ;;  %1302 = vmatmul.mubr.bf16.vlgmr.msra.gmra.mrb[4].mxu0 %v622_v8 }
 0x31f   : > { %1588 = shalt.err (!%p1585_p7)
}
 0x320   : > { %s1589_s11 = scalar_lea.hbm %s2092_s10, 64  ;;  %s1593_s17 = scalar_lea.hbm %s2264_s7, 128 }
 0x321   : > { %p1590_p13 = scmp.ne.s32.totalorder %s2092_s10, %s1589_s11  ;;  %p1594_p2 = scmp.lt.u32.totalorder %s2092_s10, %s2264_s7 }
 0x322   : > { %p1595_p12 = scmp.lt.u32.totalorder %s1593_s17, %s1589_s11  ;;  %p1597_p1 = scmp.lt.u32.totalorder %s1589_s11, %s2092_s10 }
 0x323   : > { %p1591_p8 = pnand %p1590_p13, %p2312_p6 }
 0x324   : > { %p1596_p0 = por %p1595_p12, %p1594_p2 }
 0x325   : > { %p1592_p11 = pneg %p1591_p8 }
 0x326   : > { %p1598_p10 = por %p1597_p1, %p1596_p0 }
 0x328   : > { %p1599_p3 = pnand %p1598_p10, %p1592_p11 }
 0x32a   : > { %1602 = shalt.err (!%p1599_p3)
}
 0x32b   : > { %1317 = dma.vmem_to_hbm [thread:$0]  (%p2312_p6), %s929_s13, 64, %s2092_s10, %s899_s20   ;;  %vm868_vm2 = vcmask 519168  }
 0x32c   : > { %s2113_s25 = scalar_lea.vmem [#allocation14], %s2050_s22  ;;  %s2279_s13 = smov 64  }
 0x32d   : > { %s487_s26 = scalar_lea.vmem [#allocation13], %s2050_s22  ;;  %s480_s10 = scalar_lea.vmem [#allocation11], %s2050_s22 }
 0x32e   : > { %s959_s20 = sshll.u32 %s487_s26, 4  ;;  %s942_s27 = sshll.u32 %s480_s10, 4  ;;  %s2125_s20 = int_to_ptr.vmem [resolvable:$true] %s959_s20  ;;  %s2128_s27 = int_to_ptr.vmem [resolvable:$true] %s942_s27 }
 0x32f   : > { %s1273_s21 = sshll.u32 %s1753_s16, 7  ;;  %s976_s24 = sshll.u32 %s2113_s25, 4  ;;  %s2136_s24 = int_to_ptr.vmem [resolvable:$true] %s976_s24 }
 0x330   : > { %s2133_s22 = scalar_lea.hbm %s2265_s8, %s1273_s21  ;;  %s2313_s12 = sld [smem:[#allocation33_spill]] }
 0x331   : > { %s2316_s29 = sand.u32 1, %s1866_s19   ;;  %s1603_s1 = scalar_lea.vmem %s2128_s27, 128 }
 0x332   : > { %s2151_s11 = scalar_lea.sflag [#allocation12], %s2316_s29  ;;  %p1604_p4 = scmp.ne.s32.totalorder %s2128_s27, %s1603_s1 }
 0x334   : > { %p1605_p9 = pnand %p1604_p4, %p2312_p6 }
 0x336   : > { %s2141_s17 = scalar_lea.hbm %s2313_s12, %s1273_s21  ;;  %p1606_p5 = pneg %p1605_p9 }
 0x3f1   : > { %v817_v9 = vpop.f32.mrb[0].mxu1  ;;  %v858_v10 = vpop.f32.mrb[4].mxu0 }
 0x3f2   : > { %v866_v11 = vmul.f32 0.125, %v817_v9  ;;  %v872_v12 = vpack.c.bf16 %v858_v10, %v858_v10  ;;  %v819_v13 = vpop.f32.mrb[1].mxu1  ;;  %v1303_v14 = vpop.f32.mrb[5].mxu0 }
 0x3f3   : > { %v870_v15 = vpack.c.bf16 %v819_v13, %v819_v13  ;;  %v821_v16 = vpop.f32.mrb[2].mxu1  ;;  %v861_v17 = vpop.f32.mrb[6].mxu0 }
 0x3f4   : > { %v867_v18 = vpack.c.bf16 %v866_v11, %v866_v11  ;;  %v822_v19 = vpop.f32.mrb[3].mxu1  ;;  %v1304_v20 = vpop.f32.mrb[7].mxu0  ;;  %873 = vst.msk [vmem:[%s2113_s25] sm:$0xf] %vm868_vm2, %v872_v12 }
 0x3f5   : > { %885 = vrot.lane.b32.xlu1 %v870_v15, %s2279_s13  ;;  %871 = vst.msk [vmem:[%s487_s26] sm:$0xf] %vm868_vm2, %v870_v15 }
 0x3f6   : > { %877 = vrot.lane.b32.xlu0 %v867_v18, %s2279_s13  ;;  %869 = vst.msk [vmem:[%s480_s10] sm:$0xf] %vm868_vm2, %v867_v18 }
 0x3f9   : > { %893 = vrot.lane.b32.xlu1 %v872_v12, %s2279_s13  ;;  %s2314_s13 = sld [smem:[#allocation34_spill]] }
 0x3ff   : > { %s2315_s23 = smov %s2314_s13  ;;  %s2147_s0 = scalar_lea.hbm %s2314_s13, %s1273_s21 }
 0x467   : > { %v886_v21 = vpop.permute.xlu1 %885 }
 0x468   : > { %1254 = vst.msk [vmem:[%s487_s26 + $0x4] sm:$0xf] %vm868_vm2, %v886_v21  ;;  %v878_v22 = vpop.permute.xlu0 %877  ;;  %s1776_s26 = smov [#allocation11]  }
 0x469   : > { %1252 = vst.msk [vmem:[%s480_s10 + $0x4] sm:$0xf] %vm868_vm2, %v878_v22  ;;  %s1607_s3 = sshll.u32 %s1776_s26, 4  ;;  %s1608_s3 = int_to_ptr.vmem [resolvable:$false] %s1607_s3 }
 0x46a   : > { %s1609_s16 = scalar_lea.vmem %s1608_s3, 256  ;;  %p1610_p7 = scmp.lt.s32.totalorder %s2128_s27, %s1608_s3 }
 0x46b   : > { %p1611_p13 = scmp.lt.s32.totalorder %s1609_s16, %s1603_s1 }
 0x46d   : > { %p1612_p8 = por %p1611_p13, %p1610_p7 }
 0x46f   : > { %p1613_p11 = pnand %p1612_p8, %p1606_p5 }
 0x471   : > { %1616 = shalt.err (!%p1613_p11)
}
 0x472   : > { %s1617_s19 = scalar_lea.hbm %s2133_s22, 128  ;;  %s1621_s21 = scalar_lea.hbm %s2265_s8, 256 }
 0x473   : > { %p1618_p2 = scmp.ne.s32.totalorder %s2133_s22, %s1617_s19  ;;  %p1622_p1 = scmp.lt.u32.totalorder %s2133_s22, %s2265_s8 }
 0x474   : > { %p1623_p10 = scmp.lt.u32.totalorder %s1621_s21, %s1617_s19  ;;  %p1625_p4 = scmp.lt.u32.totalorder %s1617_s19, %s2133_s22 }
 0x475   : > { %p1619_p12 = pnand %p1618_p2, %p2312_p6 }
 0x476   : > { %p1624_p3 = por %p1623_p10, %p1622_p1 }
 0x477   : > { %p1620_p0 = pneg %p1619_p12 }
 0x478   : > { %p1626_p9 = por %p1625_p4, %p1624_p3 }
 0x47a   : > { %p1627_p5 = pnand %p1626_p9, %p1620_p0 }
 0x47c   : > { %1630 = shalt.err (!%p1627_p5)
}
 0x47d   : > { %s1777_s1 = smov 4   ;;  %s2317_s28 = smov 64   ;;  %v894_v23 = vpop.permute.xlu1 %893 }
 0x47e   : > { %1318 = dma.vmem_to_hbm [thread:$0]  (%p2312_p6), %s2128_s27, 128, %s2133_s22, %s2151_s11, %s2317_s28, %s2317_s28, %s1777_s1  }
 0x47f   : > { %s1631_s9 = scalar_lea.vmem %s2125_s20, 128  ;;  %s1778_s29 = smov [#allocation13]  }
 0x480   : > { %p1632_p7 = scmp.ne.s32.totalorder %s2125_s20, %s1631_s9  ;;  %s1635_s26 = sshll.u32 %s1778_s29, 4  ;;  %s1636_s26 = int_to_ptr.vmem [resolvable:$false] %s1635_s26 }
 0x481   : > { %s1637_s16 = scalar_lea.vmem %s1636_s26, 256  ;;  %p1638_p11 = scmp.lt.s32.totalorder %s2125_s20, %s1636_s26 }
 0x482   : > { %p1633_p13 = pnand %p1632_p7, %p2312_p6  ;;  %p1639_p2 = scmp.lt.s32.totalorder %s1637_s16, %s1631_s9 }
 0x484   : > { %p1634_p8 = pneg %p1633_p13  ;;  %p1640_p12 = por %p1639_p2, %p1638_p11 }
 0x486   : > { %p1641_p0 = pnand %p1640_p12, %p1634_p8 }
 0x488   : > { %1644 = shalt.err (!%p1641_p0)
}
 0x489   : > { %s1645_s27 = scalar_lea.hbm %s2141_s17, 128  ;;  %s1649_s13 = scalar_lea.hbm %s2313_s12, 256 }
 0x48a   : > { %p1646_p1 = scmp.ne.s32.totalorder %s2141_s17, %s1645_s27  ;;  %p1650_p4 = scmp.lt.u32.totalorder %s2141_s17, %s2313_s12 }
 0x48b   : > { %p1651_p9 = scmp.lt.u32.totalorder %s1649_s13, %s1645_s27  ;;  %p1653_p7 = scmp.lt.u32.totalorder %s1645_s27, %s2141_s17 }
 0x48c   : > { %p1647_p10 = pnand %p1646_p1, %p2312_p6 }
 0x48d   : > { %p1652_p5 = por %p1651_p9, %p1650_p4 }
 0x48e   : > { %p1648_p3 = pneg %p1647_p10 }
 0x48f   : > { %p1654_p13 = por %p1653_p7, %p1652_p5 }
 0x491   : > { %p1655_p8 = pnand %p1654_p13, %p1648_p3 }
 0x493   : > { %1658 = shalt.err (!%p1655_p8)
}
 0x494   : > { %1319 = dma.vmem_to_hbm [thread:$0]  (%p2312_p6), %s2125_s20, 128, %s2141_s17, %s2151_s11, %s2317_s28, %s2317_s28, %s1777_s1  }
 0x495   : > { %1256 = vst.msk [vmem:[%s2113_s25 + $0x4] sm:$0xf] %vm868_vm2, %v894_v23  ;;  %s914_s6 = scalar_lea.sflag [#allocation15], %s2047_s2  ;;  %s1659_s3 = scalar_lea.vmem %s2136_s24, 128 }
 0x496   : > { %p1660_p11 = scmp.ne.s32.totalorder %s2136_s24, %s1659_s3  ;;  %s1779_s9 = smov [#allocation14]  }
 0x497   : > { %s1663_s29 = sshll.u32 %s1779_s9, 4  ;;  %s1664_s29 = int_to_ptr.vmem [resolvable:$false] %s1663_s29 }
 0x498   : > { %p1661_p2 = pnand %p1660_p11, %p2312_p6  ;;  %s1665_s26 = scalar_lea.vmem %s1664_s29, 256 }
 0x499   : > { %p1666_p0 = scmp.lt.s32.totalorder %s2136_s24, %s1664_s29  ;;  %p1667_p1 = scmp.lt.s32.totalorder %s1665_s26, %s1659_s3 }
 0x49a   : > { %p1662_p12 = pneg %p1661_p2 }
 0x49b   : > { %p1668_p10 = por %p1667_p1, %p1666_p0 }
 0x49d   : > { %p1669_p3 = pnand %p1668_p10, %p1662_p12 }
 0x49f   : > { %1672 = shalt.err (!%p1669_p3)
}
 0x4a0   : > { %s1673_s25 = scalar_lea.hbm %s2147_s0, 128  ;;  %s1677_s11 = scalar_lea.hbm %s2315_s23, 256 }
 0x4a1   : > { %p1674_p4 = scmp.ne.s32.totalorder %s2147_s0, %s1673_s25  ;;  %p1678_p7 = scmp.lt.u32.totalorder %s2147_s0, %s2315_s23 }
 0x4a2   : > { %p1679_p13 = scmp.lt.u32.totalorder %s1677_s11, %s1673_s25  ;;  %p1681_p11 = scmp.lt.u32.totalorder %s1673_s25, %s2147_s0 }
 0x4a3   : > { %p1675_p9 = pnand %p1674_p4, %p2312_p6 }
 0x4a4   : > { %p1680_p8 = por %p1679_p13, %p1678_p7 }
 0x4a5   : > { %p1676_p5 = pneg %p1675_p9 }
 0x4a6   : > { %p1682_p2 = por %p1681_p11, %p1680_p8 }
 0x4a8   : > { %p1683_p12 = pnand %p1682_p2, %p1676_p5 }
 0x4aa   : > { %1686 = shalt.err (!%p1683_p12)
}
 0x4ab   : > { %1320 = dma.vmem_to_hbm [thread:$0]  (%p2312_p6), %s2136_s24, 128, %s2147_s0, %s914_s6, %s2317_s28, %s2317_s28, %s1777_s1  }
 0x4ac PF: > { %s2318_s22 = sld [smem:[#allocation23_spill]]  ;;  %s2319_s19 = sld [smem:[#allocation25_spill]] }
 0x4ad   : > { %p2321_p1 = scmp.ge.s32.totalorder %s1761_s18, 2 }
 0x4b2   : > { %s991_s13 = sand.u32 1, %s2318_s22   ;;  %p2320_p0 = scmp.ne.s32.totalorder %s2319_s19, 0 }
 0x4b3   : > { %s992_s10 = scalar_lea.sflag [#allocation4], %s991_s13 }
 0x4b4   : > { %p1340_p10 = pnand %p2321_p1, %p2320_p0 }
 0x4b6   : > { %1728 = dma.done.wait (!%p1340_p10), %s992_s10, 64  }
 0x4b7   : > { %1730 = vsyncadd (!%p1340_p10), %s992_s10, 4294967232  ;;  %s2322_s30 = sadd.s32 4294967294, %s1761_s18  }
 0x4b8   : > { %s1000_s21 = sand.u32 1, %s2322_s30  }
 0x4b9   : > { %s1001_s3 = scalar_lea.sflag [#allocation12], %s1000_s21 }
 0x4ba   : > { %1732 = dma.done.wait (!%p1340_p10), %s1001_s3, 256  }
 0x4bb   : > { %1734 = vsyncadd (!%p1340_p10), %s1001_s3, 4294967040  ;;  %s1019_s2 = scalar_lea.sflag [#allocation15], %s991_s13 }
 0x4bc   : > { %1736 = dma.done.wait (!%p1340_p10), %s1019_s2, 128  }
 0x4bd   : > { %1738 = vsyncadd (!%p1340_p10), %s1019_s2, 4294967168  ;;  %s37_s18 = sadd.s32 1, %s1761_s18   ;;  %s2323_s0 = sld [smem:[#allocation27_spill]] }
 0x4be   : > { %p34_p6 = scmp.ge.s32.totalorder %s37_s18, 4   ;;  %s2324_s16 = sld [smem:[#allocation24_spill]] }
 0x4bf   : > { %s2325_s17 = sld [smem:[#allocation26_spill]]  ;;  %s2326_s13 = smov %s1745_s14 }
 0x4c0   : > { %s2327_s14 = smov %s1749_s15  ;;  %36 = sbr.rel (!%p34_p6) target bundleno = 21 (0x15), region = 166 }
 0x4c3   : > { %s2328_s15 = smov %s2323_s0 }
 0x4c7   :  { %1024 = vsyncpa [#allocation3], 1 }
 0x4c8   :  { %1026 = vsyncpa [#allocation3 + $0x1], 1 }
 0x4c9   :  { %1027 = vsyncpa [#allocation6], 1 }
 0x4ca   :  { %1029 = vsyncpa [#allocation6 + $0x1], 1 }
 0x4cb   :  { %1030 = vsyncpa [#allocation9], 1 }
 0x4cc   :  { %1031 = vsyncpa [#allocation4], 1 }
 0x4cd   :  { %1033 = vsyncpa [#allocation4 + $0x1], 1 }
 0x4ce   :  { %1034 = vsyncpa [#allocation12], 1 }
 0x4cf   :  { %1036 = vsyncpa [#allocation12 + $0x1], 1 }
 0x4d0   :  { %1037 = vsyncpa [#allocation15], 1 }
 0x4d1   :  { %1039 = vsyncpa [#allocation15 + $0x1], 1 }

</bundles_post_ra>
